<compile_context>
chip_gen: v7x
topology: tpu7x:2x2x1
jax: 0.10.0
libtpu: 0.0.40
codegen_flags: <defaults>
</compile_context>

<pallas_src>
import numpy as np
import jax
import jax.numpy as jnp
from jax.experimental import pallas as pl
from jax.experimental.pallas import tpu as pltpu


def bilinear_matrix(out_size, in_size):
    """Interpolation matrix matching nn.Upsample(mode='bilinear', align_corners=False)."""
    A = np.zeros((out_size, in_size), np.float32)
    scale = in_size / out_size
    for o in range(out_size):
        src = (o + 0.5) * scale - 0.5
        src = max(src, 0.0)
        i0 = min(int(np.floor(src)), in_size - 1)
        i1 = min(i0 + 1, in_size - 1)
        frac = src - i0
        A[o, i0] += 1.0 - frac
        A[o, i1] += frac
    return A


def _pick_block_batch(N, H_in, min_rows=256, max_rows=2048):
    """Images per grid step so the MXU M dim (nb*H_in sublanes) is filled.

    Small problems -> single grid step (per-step overhead dominates).  Split into
    multiple 'parallel' steps only when each step still carries >= min_rows rows;
    cap the per-step block at max_rows rows so VMEM tiles stay bounded.
    """
    if N * H_in <= max_rows:
        half = N // 2
        if N % 2 == 0 and half * H_in >= min_rows:
            return half            # 2 parallel steps, each still MXU-filling
        return N                   # one grid step
    divisors = [d for d in range(1, N + 1) if N % d == 0 and d * H_in <= max_rows]
    return max(divisors) if divisors else 1


def _make_decoder_kernel(nb, H_in, wc_out):
    def kernel(x_ref, a_ref, g_ref, bias_ref, o_ref):
        # x_ref   : (nb*H_in, wc_in)        bf16  (nb images stacked on sublanes)
        # a_ref   : (H_out, 3*H_in)         bf16  (H-upsample + H-shift, K-concatenated)
        # g_ref   : (wc_in, 3*wc_out)       bf16  (W-upsample + conv mixing, dy-concatenated)
        # bias_ref: (1, nb*wc_out)          f32
        # o_ref   : (H_out, nb*wc_out)      f32

        # Stage 1: channel/W mixing at the cheap input-H resolution.
        # One wide MXU matmul, lane-dense N = 3*wc_out.
        y = jnp.dot(x_ref[...], g_ref[...], preferred_element_type=jnp.float32)

        # Restack so batch sits on the lane axis and the 3 dy taps sit on the K
        # (sublane) axis of the H-stage matmul.  All slices are static and
        # (8,128)-aligned (sublane offsets multiples of H_in, lane offsets
        # multiples of wc_out >= 128); done in f32 (full-vreg rows), then one cast.
        s = jnp.concatenate(
            [jnp.concatenate(
                [y[b * H_in:(b + 1) * H_in, dy * wc_out:(dy + 1) * wc_out]
                 for b in range(nb)], axis=1)
             for dy in range(3)], axis=0)                    # (3*H_in, nb*wc_out)
        s = s.astype(jnp.bfloat16)  # deliberate double rounding for MXU throughput

        # Stage 2: H-upsample + H-shift as a single matmul (K = 3*H_in, N = nb*wc_out).
        acc = jnp.dot(a_ref[...], s, preferred_element_type=jnp.float32)

        # Bias (pre-tiled on host) + ReLU; lane-dense unmasked store.
        o_ref[...] = jnp.maximum(acc + bias_ref[...], 0.0)

    return kernel


def decoder_block_forward(x_nchw, weight, bias, up_size, block_batch=None):
    """x_nchw: (N, C_in, H, W); weight: (C_out, C_in, 3, 3); bias: (C_out,)."""
    N, C_in, H_in, W_in = x_nchw.shape
    C_out = weight.shape[0]
    H_out = W_out = int(up_size)
    wc_in = W_in * C_in
    wc_out = W_out * C_out

    if block_batch is None:
        block_batch = _pick_block_batch(N, H_in)
    nb = int(block_batch)
    assert N % nb == 0, "block_batch must divide the batch size"
    n_blocks = N // nb

    # ---------------- host-side constant folding (plain numpy) ----------------
    A_h = bilinear_matrix(H_out, H_in)                                   # (H_out, H_in)
    A_w = bilinear_matrix(W_out, W_in)                                   # (W_out, W_in)

    # Fold conv padding=1 along H into 3 shifted, zero-edged copies of A_h, then
    # concatenate along K so the H stage is one matmul (no block-diag over batch).
    A_shift = np.zeros((3, H_out, H_in), np.float32)
    for dy in range(3):
        lo = max(0, 1 - dy)                   # output rows h with 0 <= h+dy-1 < H_out
        hi = min(H_out, H_out + 1 - dy)
        A_shift[dy, lo:hi, :] = A_h[lo + dy - 1: hi + dy - 1, :]
    A_cat = np.concatenate([A_shift[0], A_shift[1], A_shift[2]], axis=1)  # (H_out, 3*H_in)

    # Fold W-upsample (B_w) and 3x3-conv channel/W mixing (M[dy]) into Gcat.
    B_w = np.kron(A_w.T, np.eye(C_in, dtype=np.float32))                 # (wc_in, W_out*C_in)
    wnp = np.asarray(weight, np.float32)                                 # (C_out, C_in, 3, 3)
    M = np.zeros((3, W_out * C_in, wc_out), np.float32)
    for dy in range(3):
        for w2 in range(W_out):
            for dx in range(3):
                w = w2 + dx - 1
                if 0 <= w < W_out:
                    M[dy, w * C_in:(w + 1) * C_in, w2 * C_out:(w2 + 1) * C_out] += \
                        wnp[:, :, dy, dx].T
    G_cat = np.concatenate([B_w @ M[dy] for dy in range(3)], axis=1)     # (wc_in, 3*wc_out)

    # Bias tiled for the batched-on-lanes output layout (1, nb*W_out*C_out).
    bias_row = np.tile(np.asarray(bias, np.float32), nb * W_out).reshape(1, nb * wc_out)

    # NCHW -> (N*H_in, W_in*C_in), images stacked along sublanes.
    # TODO(synk): drop this + the output transpose if the model can stay NHWC.
    x_flat = jnp.transpose(x_nchw, (0, 2, 3, 1)).reshape(N * H_in, wc_in)

    kernel = _make_decoder_kernel(nb, H_in, wc_out)

    out_flat = pl.pallas_call(
        kernel,
        out_shape=jax.ShapeDtypeStruct((n_blocks * H_out, nb * wc_out), jnp.float32),
        grid_spec=pltpu.PrefetchScalarGridSpec(
            num_scalar_prefetch=0,
            grid=(n_blocks,),
            in_specs=[
                pl.BlockSpec((nb * H_in, wc_in), lambda i: (i, 0)),
                pl.BlockSpec((H_out, 3 * H_in), lambda i: (0, 0)),      # grid-invariant
                pl.BlockSpec((wc_in, 3 * wc_out), lambda i: (0, 0)),    # grid-invariant
                pl.BlockSpec((1, nb * wc_out), lambda i: (0, 0)),       # grid-invariant
            ],
            out_specs=pl.BlockSpec((H_out, nb * wc_out), lambda i: (i, 0)),
        ),
        compiler_params=pltpu.CompilerParams(
            dimension_semantics=("parallel",),
            vmem_limit_bytes=32 << 20,
        ),
    )(
        x_flat.astype(jnp.bfloat16),
        jnp.asarray(A_cat, jnp.bfloat16),
        jnp.asarray(G_cat, jnp.bfloat16),
        jnp.asarray(bias_row, jnp.float32),
    )

    # (n_blocks*H_out, nb*wc_out) -> NCHW
    out = out_flat.reshape(n_blocks, H_out, nb, W_out, C_out)
    out = jnp.transpose(out, (0, 2, 4, 1, 3))                            # (blk, nb, C, H, W)
    return out.reshape(N, C_out, H_out, W_out)


if __name__ == "__main__":
    N, C_in, C_out, H_in, W_in, up_size = 2, 4, 8, 8, 8, 16

    key = jax.random.PRNGKey(0)
    k1, k2, k3 = jax.random.split(key, 3)
    x = jax.random.normal(k1, (N, C_in, H_in, W_in), jnp.float32)
    bound = 1.0 / np.sqrt(C_in * 3 * 3)                     # Conv2d default init range
    weight = jax.random.uniform(k2, (C_out, C_in, 3, 3), jnp.float32, -bound, bound)
    bias = jax.random.uniform(k3, (C_out,), jnp.float32, -bound, bound)

    out = jax.block_until_ready(decoder_block_forward(x, weight, bias, up_size))
    assert out.shape == (N, C_out, up_size, up_size)

    # pure-JAX f32 reference (bilinear via interpolation matrices + lax conv)
    A_h = jnp.asarray(bilinear_matrix(up_size, H_in))
    A_w = jnp.asarray(bilinear_matrix(up_size, W_in))
    x_nhwc = jnp.transpose(x, (0, 2, 3, 1))
    u1 = jnp.einsum('oh,nhwc->nowc', A_h, x_nhwc)
    u2 = jnp.einsum('pw,nowc->nopc', A_w, u1)
    w_hwio = jnp.transpose(weight, (2, 3, 1, 0))
    conv = jax.lax.conv_general_dilated(u2, w_hwio, (1, 1), 'SAME',
                                        dimension_numbers=('NHWC', 'HWIO', 'NHWC'))
    ref = jnp.maximum(conv + bias[None, None, None, :], 0.0)
    ref = jnp.transpose(ref, (0, 3, 1, 2))

    # bf16 operands with f32 accumulation -> looser tolerance vs the f32 reference.
    np.testing.assert_allclose(np.asarray(out), np.asarray(ref), atol=5e-2, rtol=5e-2)
    print("KERNEL_OK")
</pallas_src>

<mosaic_0001>
module attributes {stable_mosaic.version = 11 : i64} {
  func.func @kernel(%arg0: i32, %arg1: memref<16x32xbf16, #tpu.memory_space<vmem>>, %arg2: memref<16x24xbf16, #tpu.memory_space<vmem>>, %arg3: memref<32x384xbf16, #tpu.memory_space<vmem>>, %arg4: memref<1x256xf32, #tpu.memory_space<vmem>>, %arg5: memref<16x256xf32, #tpu.memory_space<vmem>>) attributes {dimension_semantics = [#tpu.dimension_semantics<parallel>], iteration_bounds = array<i64: 1>, scalar_prefetch = 0 : i64, scratch_operands = 0 : i64, tpu.core_type = #tpu.core_type<tc>, window_params = [{transform_indices = @transform_0, window_bounds = array<i64: 16, 32>}, {pipeline_mode = #tpu.pipeline_mode<synchronous>, transform_indices = @transform_1, window_bounds = array<i64: 16, 24>}, {pipeline_mode = #tpu.pipeline_mode<synchronous>, transform_indices = @transform_2, window_bounds = array<i64: 32, 384>}, {pipeline_mode = #tpu.pipeline_mode<synchronous>, transform_indices = @transform_3, window_bounds = array<i64: 1, 256>}, {transform_indices = @transform_4, window_bounds = array<i64: 16, 256>}]} {
    %c0 = arith.constant 0 : index
    %c0_0 = arith.constant 0 : index
    %0 = vector.load %arg1[%c0, %c0_0] : memref<16x32xbf16, #tpu.memory_space<vmem>>, vector<16x32xbf16>
    %c0_1 = arith.constant 0 : index
    %c0_2 = arith.constant 0 : index
    %1 = vector.load %arg3[%c0_1, %c0_2] : memref<32x384xbf16, #tpu.memory_space<vmem>>, vector<32x384xbf16>
    %cst = arith.constant dense<0.000000e+00> : vector<16x384xf32>
    %2 = tpu.matmul %0, %1, %cst {dimension_numbers = #tpu.dot_dimension_numbers<[1], [0], [0], [1], [0, 0, 1, 1], [], []>} : vector<16x32xbf16>, vector<32x384xbf16>, vector<16x384xf32> -> vector<16x384xf32>
    %3 = vector.extract_strided_slice %2 {offsets = [0, 0], sizes = [8, 128], strides = [1, 1]} : vector<16x384xf32> to vector<8x128xf32>
    %4 = vector.extract_strided_slice %2 {offsets = [8, 0], sizes = [8, 128], strides = [1, 1]} : vector<16x384xf32> to vector<8x128xf32>
    %5 = tpu.concatenate %3, %4 in 1 : vector<8x128xf32>, vector<8x128xf32> -> vector<8x256xf32>
    %6 = vector.extract_strided_slice %2 {offsets = [0, 128], sizes = [8, 128], strides = [1, 1]} : vector<16x384xf32> to vector<8x128xf32>
    %7 = vector.extract_strided_slice %2 {offsets = [8, 128], sizes = [8, 128], strides = [1, 1]} : vector<16x384xf32> to vector<8x128xf32>
    %8 = tpu.concatenate %6, %7 in 1 : vector<8x128xf32>, vector<8x128xf32> -> vector<8x256xf32>
    %9 = vector.extract_strided_slice %2 {offsets = [0, 256], sizes = [8, 128], strides = [1, 1]} : vector<16x384xf32> to vector<8x128xf32>
    %10 = vector.extract_strided_slice %2 {offsets = [8, 256], sizes = [8, 128], strides = [1, 1]} : vector<16x384xf32> to vector<8x128xf32>
    %11 = tpu.concatenate %9, %10 in 1 : vector<8x128xf32>, vector<8x128xf32> -> vector<8x256xf32>
    %12 = tpu.concatenate %5, %8, %11 in 0 : vector<8x256xf32>, vector<8x256xf32>, vector<8x256xf32> -> vector<24x256xf32>
    %13 = arith.truncf %12 : vector<24x256xf32> to vector<24x256xbf16>
    %c0_3 = arith.constant 0 : index
    %c0_4 = arith.constant 0 : index
    %14 = vector.load %arg2[%c0_3, %c0_4] : memref<16x24xbf16, #tpu.memory_space<vmem>>, vector<16x24xbf16>
    %cst_5 = arith.constant dense<0.000000e+00> : vector<16x256xf32>
    %15 = tpu.matmul %14, %13, %cst_5 {dimension_numbers = #tpu.dot_dimension_numbers<[1], [0], [0], [1], [0, 0, 1, 1], [], []>} : vector<16x24xbf16>, vector<24x256xbf16>, vector<16x256xf32> -> vector<16x256xf32>
    %c0_6 = arith.constant 0 : index
    %c0_7 = arith.constant 0 : index
    %16 = vector.load %arg4[%c0_6, %c0_7] : memref<1x256xf32, #tpu.memory_space<vmem>>, vector<1x256xf32>
    %17 = vector.broadcast %16 : vector<1x256xf32> to vector<16x256xf32>
    %18 = arith.addf %15, %17 : vector<16x256xf32>
    %cst_8 = arith.constant 0.000000e+00 : f32
    %19 = vector.broadcast %cst_8 : f32 to vector<16x256xf32>
    %20 = arith.maximumf %18, %19 : vector<16x256xf32>
    %c0_9 = arith.constant 0 : index
    %c0_10 = arith.constant 0 : index
    %21 = vector.load %arg5[%c0_9, %c0_10] : memref<16x256xf32, #tpu.memory_space<vmem>>, vector<16x256xf32>
    tpu.vector_store %arg5[%c0_9, %c0_10], %20 {strides = array<i32>} : memref<16x256xf32, #tpu.memory_space<vmem>>, vector<16x256xf32>,
    return
  }
  func.func @transform_0(%arg0: i32) -> (i32, i32) {
    %c0_i32 = arith.constant 0 : i32
    %c0_i32_0 = arith.constant 0 : i32
    return %arg0, %c0_i32 : i32, i32
  }
  func.func @transform_1(%arg0: i32) -> (i32, i32) {
    %c0_i32 = arith.constant 0 : i32
    %c0_i32_0 = arith.constant 0 : i32
    %c0_i32_1 = arith.constant 0 : i32
    return %c0_i32, %c0_i32_0 : i32, i32
  }
  func.func @transform_2(%arg0: i32) -> (i32, i32) {
    %c0_i32 = arith.constant 0 : i32
    %c0_i32_0 = arith.constant 0 : i32
    %c0_i32_1 = arith.constant 0 : i32
    return %c0_i32, %c0_i32_0 : i32, i32
  }
  func.func @transform_3(%arg0: i32) -> (i32, i32) {
    %c0_i32 = arith.constant 0 : i32
    %c0_i32_0 = arith.constant 0 : i32
    %c0_i32_1 = arith.constant 0 : i32
    return %c0_i32, %c0_i32_0 : i32, i32
  }
  func.func @transform_4(%arg0: i32) -> (i32, i32) {
    %c0_i32 = arith.constant 0 : i32
    %c0_i32_0 = arith.constant 0 : i32
    return %arg0, %c0_i32 : i32, i32
  }
}

</mosaic_0001>

<bundles_post_ra>
// kernel: tpu_custom_call.1
= control target key start
LH: loop header
LB: loop body
LE: loop exit
PB: predicated region body
PF: predicated region fallthrough
CT: control target
= control target key end

     0   :  { %9 = vsyncpa [#allocation3], 0  ;;  %s534_s0 = inlined_call_operand.hbm [shape: bf16[16,32], index: 0, kind: input, shape index: {}]   ;;  %s535_s1 = inlined_call_operand.hbm [shape: bf16[16,24], index: 1, kind: input, shape index: {}]   ;;  %s536_s2 = inlined_call_operand.hbm [shape: bf16[32,384], index: 2, kind: input, shape index: {}]   ;;  %s537_s3 = inlined_call_operand.vmem [shape: f32[1,256], index: 3, kind: input, shape index: {}]   ;;  %s538_s4 = inlined_call_operand.hbm [shape: f32[16,256], index: 4, kind: output, shape index: {}]  }
   0x1   :  { %10 = vsyncpa [#allocation6], 0 }
   0x2   :  { %11 = vsyncpa [#allocation4], 0  ;;  %s438_s15 = smov [#allocation5]   ;;  %s439_s17 = smov [#allocation2]  }
   0x3   :  { %s29_s16 = sshll.u32 %s438_s15, 4  ;;  %s17_s18 = sshll.u32 %s439_s17, 4  ;;  %s30_s16 = int_to_ptr.vmem [resolvable:$true] %s29_s16  ;;  %s476_s18 = int_to_ptr.vmem [resolvable:$true] %s17_s18 }
   0x4   :  { %s344_s21 = scalar_lea.hbm %s535_s1, 128 }
   0x5   :  { %p345_p0 = scmp.ne.s32.totalorder %s535_s1, %s344_s21  ;;  %p348_p1 = scmp.lt.u32.totalorder %s344_s21, %s535_s1 }
   0x7   :  { %p350_p2 = pnand %p348_p1, %p345_p0 }
   0x9   :  { %353 = shalt.err (!%p350_p2)
}
   0xa   :  { %s354_s26 = scalar_lea.vmem %s30_s16, 128  ;;  %p359_p4 = scmp.lt.s32.totalorder %s30_s16, %s30_s16 }
   0xb   :  { %p355_p3 = scmp.ne.s32.totalorder %s30_s16, %s354_s26  ;;  %p360_p5 = scmp.lt.s32.totalorder %s354_s26, %s354_s26 }
   0xd   :  { %p361_p6 = por %p360_p5, %p359_p4 }
   0xf   :  { %p362_p7 = pnand %p361_p6, %p355_p3 }
  0x11   :  { %365 = shalt.err (!%p362_p7)
}
  0x12   :  { %s440_s27 = smov 64   ;;  %s441_s28 = smov 4  }
  0x13   :  { %35 = dma.hbm_to_vmem [thread:$0]  %s535_s1, 128, %s30_s16, [#allocation6], %s440_s27, %s440_s27, %s441_s28  }
  0x14   :  { %s366_s7 = scalar_lea.hbm %s534_s0, 128 }
  0x15   :  { %p367_p8 = scmp.ne.s32.totalorder %s534_s0, %s366_s7  ;;  %p370_p9 = scmp.lt.u32.totalorder %s366_s7, %s534_s0 }
  0x17   :  { %p372_p10 = pnand %p370_p9, %p367_p8 }
  0x19   :  { %375 = shalt.err (!%p372_p10)
}
  0x1a   :  { %s376_s12 = scalar_lea.vmem %s476_s18, 128  ;;  %p381_p12 = scmp.lt.s32.totalorder %s476_s18, %s476_s18 }
  0x1b   :  { %p377_p11 = scmp.ne.s32.totalorder %s476_s18, %s376_s12  ;;  %p382_p13 = scmp.lt.s32.totalorder %s376_s12, %s376_s12 }
  0x1d   :  { %p383_p0 = por %p382_p13, %p381_p12 }
  0x1f   :  { %p384_p1 = pnand %p383_p0, %p377_p11 }
  0x21   :  { %387 = shalt.err (!%p384_p1)
}
  0x22   :  { %23 = dma.hbm_to_vmem [thread:$0]  %s534_s0, 128, %s476_s18, [#allocation3], %s440_s27, %s440_s27, %s441_s28  }
  0x23   :  { %s442_s14 = smov [#allocation7]   ;;  %s388_s19 = scalar_lea.hbm %s536_s2, 768 }
  0x24   :  { %s41_s15 = sshll.u32 %s442_s14, 4  ;;  %p389_p2 = scmp.ne.s32.totalorder %s536_s2, %s388_s19  ;;  %s42_s15 = int_to_ptr.vmem [resolvable:$true] %s41_s15 }
  0x25   :  { %p392_p3 = scmp.lt.u32.totalorder %s388_s19, %s536_s2 }
  0x27   :  { %p394_p4 = pnand %p392_p3, %p389_p2 }
  0x29   :  { %397 = shalt.err (!%p394_p4)
}
  0x2a   :  { %s398_s24 = scalar_lea.vmem %s42_s15, 768  ;;  %p403_p6 = scmp.lt.s32.totalorder %s42_s15, %s42_s15 }
  0x2b   :  { %p399_p5 = scmp.ne.s32.totalorder %s42_s15, %s398_s24  ;;  %p404_p7 = scmp.lt.s32.totalorder %s398_s24, %s398_s24 }
  0x2d   :  { %p405_p8 = por %p404_p7, %p403_p6 }
  0x2f   :  { %p406_p9 = pnand %p405_p8, %p399_p5 }
  0x31   :  { %409 = shalt.err (!%p406_p9)
}
  0x32   :  { %s443_s0 = smov 192   ;;  %s444_s18 = smov 12  }
  0x33   :  { %47 = dma.hbm_to_vmem [thread:$0]  %s536_s2, 768, %s42_s15, [#allocation6], %s443_s0, %s443_s0, %s444_s18  }
  0x34   :  { %432 = dma.done.wait [#allocation3], 128  }
  0x35   :  { %433 = vsyncadd [#allocation3], 4294967168 }
  0x36   :  { %434 = dma.done.wait [#allocation6], 896  }
  0x37   :  { %435 = vsyncadd [#allocation6], 4294966400  ;;  %v445_v0 = vmov 0.0   ;;  %v446_v1 = vmov 0   ;;  %vm447_vm0 = vmmov 0   ;;  %v342_v8 = vld [vmem:[#allocation2] sm:$0xff]   ;;  %v203_v23 = vlaneseq }
  0x38   :  { %313 = vmatprep.subr.bf16.mxu1 %v445_v0  ;;  %143 = vmatprep.mubr.bf16.mxu0 %v446_v1  ;;  %v334_v2 = vld [vmem:[#allocation7 + $0x4] ss:$12 sps:$4 sm:$0xff]   ;;  %v336_v3 = vld [vmem:[#allocation7] ss:$12 sps:$4 sm:$0xff]   ;;  %v337_v4 = vld [vmem:[#allocation7 + $0x8] ss:$12 sps:$4 sm:$0xff]  }
  0x39   :  { %317 = vmatprep.mubr.msk.bf16.mxu1 %vm447_vm0, %v445_v0  ;;  %111 = vmatprep.subr.bf16.mxu0 %v334_v2  ;;  %v338_v5 = vld [vmem:[#allocation7 + $0x1c] ss:$12 sps:$4 sm:$0xff]   ;;  %v340_v6 = vld [vmem:[#allocation7 + $0x18] ss:$12 sps:$4 sm:$0xff]   ;;  %v341_v7 = vld [vmem:[#allocation7 + $0x20] ss:$12 sps:$4 sm:$0xff]  }
  0x3a   :  { %112 = vmatpush1.bf16.msra.mxu0 %v336_v3  ;;  %314 = vmatpush3.bf16.msra.mxu1 %v337_v4  ;;  %vm107_vm1 = vcmask 261120   ;;  %vm222_vm2 = vcmask 1043456   ;;  %v343_v22 = vld [vmem:[#allocation5] sm:$0xff]   ;;  %vm218_vm3 = vcmask 195584   ;;  %v204_v24 = vshrl.u32 %v203_v23, 7  ;;  %s448_s28 = smov [#allocation8]  }
  0x3b   :  { %113 = vmatprep.subr.bf16.mxu0 %v338_v5  ;;  %315 = vmatprep.subr.bf16.mxu1 %v445_v0  ;;  %v201_v26 = vld [vmem:[%s537_s3] sm:$0x3]  ;;  %s285_s29 = sshll.u32 %s448_s28, 4  ;;  %s286_s29 = int_to_ptr.vmem [resolvable:$true] %s285_s29 }
  0x3c   :  { %v205_v25 = vsub.s32 0, %v204_v24  ;;  %v209_v27 = vsub.s32 1, %v204_v24  ;;  %s410_s3 = scalar_lea.vmem %s286_s29, 512  ;;  %p415_p11 = scmp.lt.s32.totalorder %s286_s29, %s286_s29 }
  0x3d   :  { %p411_p10 = scmp.ne.s32.totalorder %s286_s29, %s410_s3  ;;  %p416_p12 = scmp.lt.s32.totalorder %s410_s3, %s410_s3 }
  0x3e   :  { %114 = vmatpush1.bf16.msra.mxu0 %v340_v6  ;;  %316 = vmatpush3.bf16.msra.mxu1 %v341_v7  ;;  %v206_v28 = vrot.slane %v201_v26, %v205_v25  ;;  %v210_v29 = vrot.slane %v201_v26, %v209_v27 }
  0x3f   :  { %p417_p13 = por %p416_p12, %p415_p11 }
  0x41   :  { %305 = vmatmul.mubr.msk.bf16.vlgmr.msra.gmra.mrb[0].mxu0 %vm107_vm1, %v342_v8  ;;  %318 = vmatmul.mubr.msk.bf16.vlgmr.msra.gmra.mrb[0].mxu1 %vm107_vm1, %v342_v8  ;;  %p418_p0 = pnand %p417_p13, %p411_p10 }
  0x42   :  { %261 = vmatprep.mubr.bf16.mxu0 %v446_v1 }
 0x114   :  { %v145_v9 = vpop.f32.mrb[0].mxu0  ;;  %v188_v11 = vpop.f32.mrb[0].mxu1 }
 0x115   :  { %v147_v10 = vpop.f32.mrb[1].mxu0  ;;  %v319_v14 = vpop.f32.mrb[1].mxu1  ;;  %v197_v20 = vpack.c.bf16 %v188_v11, %v188_v11 }
 0x116   :  { %v195_v12 = vpack.c.bf16 %v147_v10, %v145_v9  ;;  %v149_v13 = vpop.f32.mrb[2].mxu0  ;;  %v191_v16 = vpop.f32.mrb[2].mxu1 }
 0x117   :  { %v151_v15 = vpop.f32.mrb[3].mxu0  ;;  %v198_v18 = vpack.c.bf16 %v191_v16, %v191_v16  ;;  %v320_v19 = vpop.f32.mrb[3].mxu1  ;;  %v224_v21 = vsel %vm222_vm2, %v197_v20, 0 }
 0x118   :  { %v196_v17 = vpack.c.bf16 %v151_v15, %v149_v13 }
 0x11a   :  { %229 = vmatprep.subr.bf16.mxu0 %v196_v17 }
 0x11b   :  { %230 = vmatpush1.bf16.msra.mxu0 %v195_v12 }
 0x11c   :  { %308 = vmatprep.subr.msk.bf16.mxu0 %vm222_vm2, %v198_v18 }
 0x11f   :  { %232 = vmatpush1.bf16.msra.mxu0 %v224_v21 }
 0x122   :  { %309 = vmatmul.mubr.msk.bf16.vlgmr.msra.gmra.mrb[4].mxu0 %vm218_vm3, %v343_v22 }
 0x1f5   :  { %v263_v30 = vpop.f32.mrb[4].mxu0 }
 0x1f6   :  { %v264_v31 = vadd.f32 %v263_v30, %v206_v28  ;;  %v265_v32 = vpop.f32.mrb[5].mxu0 }
 0x1f7   :  { %v266_v33 = vadd.f32 %v265_v32, %v210_v29  ;;  %v267_v34 = vpop.f32.mrb[6].mxu0 }
 0x1f8   :  { %v272_v35 = vmax.f32 %v264_v31, 0.0  ;;  %v268_v36 = vadd.f32 %v267_v34, %v206_v28  ;;  %v269_v37 = vpop.f32.mrb[7].mxu0 }
 0x1f9   :  { %v273_v38 = vmax.f32 %v266_v33, 0.0  ;;  %v270_v39 = vadd.f32 %v269_v37, %v210_v29 }
 0x1fa   :  { %276 = vst [vmem:[#allocation8] sm:$0xff] %v272_v35  ;;  %v274_v40 = vmax.f32 %v268_v36, 0.0 }
 0x1fb   :  { %277 = vst [vmem:[#allocation8 + $0x8] sm:$0xff] %v273_v38  ;;  %v275_v41 = vmax.f32 %v270_v39, 0.0 }
 0x1fc   :  { %278 = vst [vmem:[#allocation8 + $0x10] sm:$0xff] %v274_v40 }
 0x1fd   :  { %279 = vst [vmem:[#allocation8 + $0x18] sm:$0xff] %v275_v41 }
 0x1fe   :  { %421 = shalt.err (!%p418_p0)
}
 0x1ff   :  { %s422_s6 = scalar_lea.hbm %s538_s4, 512 }
 0x200   :  { %p423_p1 = scmp.ne.s32.totalorder %s538_s4, %s422_s6  ;;  %p426_p2 = scmp.lt.u32.totalorder %s422_s6, %s538_s4 }
 0x202   :  { %p428_p3 = pnand %p426_p2, %p423_p1 }
 0x204   :  { %431 = shalt.err (!%p428_p3)
}
 0x205   :  { %s449_s11 = smov 256   ;;  %s450_s12 = smov 16  }
 0x206   :  { %291 = dma.vmem_to_hbm [thread:$0]  %s286_s29, 512, %s538_s4, [#allocation4], %s449_s11, %s449_s11, %s450_s12  }
 0x207   :  { %436 = dma.done.wait [#allocation4], 512  }
 0x208   :  { %437 = vsyncadd [#allocation4], 4294966784 }
 0x209   :  { %295 = vsyncpa [#allocation3], 1 }
 0x20a   :  { %296 = vsyncpa [#allocation6], 1 }
 0x20b   :  { %297 = vsyncpa [#allocation4], 1 }

</bundles_post_ra>
